<compile_context>
chip_gen: v6e
topology: v6e:2x2x1
jax: 0.10.0
libtpu: 0.0.40
codegen_flags: <defaults>
</compile_context>

<pallas_src>
import jax
import jax.numpy as jnp
from jax.experimental import pallas as pl
from jax.experimental.pallas import tpu as pltpu


def linear_kernel(x_ref, w_ref, b_ref, o_ref):
    # x_ref: (B_tile, K), w_ref: (K, N), b_ref: (1, N), o_ref: (B_tile, N)
    acc = jnp.dot(x_ref[...], w_ref[...], preferred_element_type=jnp.float32)
    o_ref[...] = (acc + b_ref[...]).astype(o_ref.dtype)


def prepare_params(weight, bias):
    """One-time (init) prep: PyTorch (N, K) weight -> (K, N); bias -> (1, N). No padding."""
    w_t = jnp.asarray(weight).T               # (K, N)
    b2d = jnp.asarray(bias).reshape(1, -1)    # (1, N)
    return w_t, b2d


# VMEM footprint is ~1 KiB/row (x lane-padded to 128 lanes + out lane-padded, f32), so the
# whole problem fits comfortably ungridded up to ~8K rows on every generation
# (16 MiB default scoped VMEM on v5e, 32 MiB on v6e/v7x).
_UNGRIDDED_MAX_ROWS = 8192
_TILE_B = 2048  # gridded-path tile: big enough to amortize ~0.35 us/step; grid len >= 2 above threshold.


def classification_model(x, w_t, b2d):
    """Pallas equivalent of torch.nn.Linear forward: x (B, K) f32 -> (B, N) f32."""
    B, K = x.shape
    N = w_t.shape[1]

    cost = pl.CostEstimate(
        flops=2 * B * K * N,
        transcendentals=0,
        bytes_accessed=4 * (B * K + K * N + N + B * N),
    )

    if B <= _UNGRIDDED_MAX_ROWS:
        # Single ungridded MXU pass: no pipeline prologue/epilogue, output written at its
        # true width — no padded writeback, no trailing slice op.
        return pl.pallas_call(
            linear_kernel,
            out_shape=jax.ShapeDtypeStruct((B, N), x.dtype),
            in_specs=[
                pl.BlockSpec(memory_space=pltpu.MemorySpace.VMEM),
                pl.BlockSpec(memory_space=pltpu.MemorySpace.VMEM),
                pl.BlockSpec(memory_space=pltpu.MemorySpace.VMEM),
            ],
            out_specs=pl.BlockSpec(memory_space=pltpu.MemorySpace.VMEM),
            cost_estimate=cost,
        )(x, w_t, b2d)

    # Large-batch path: 2048-row tiles, cdiv grid (any B works, partial last block is
    # handled by Pallas), "parallel" axis so both TensorCores are fed on v7x.
    # Weight/bias blocks are invariant across iterations and stay VMEM-resident.
    return pl.pallas_call(
        linear_kernel,
        out_shape=jax.ShapeDtypeStruct((B, N), x.dtype),
        grid=(pl.cdiv(B, _TILE_B),),
        in_specs=[
            pl.BlockSpec((_TILE_B, K), lambda i: (i, 0)),
            pl.BlockSpec((K, N), lambda i: (0, 0)),
            pl.BlockSpec((1, N), lambda i: (0, 0)),
        ],
        out_specs=pl.BlockSpec((_TILE_B, N), lambda i: (i, 0)),
        compiler_params=pltpu.CompilerParams(
            dimension_semantics=("parallel",),
        ),
        cost_estimate=cost,
    )(x, w_t, b2d)


if __name__ == "__main__":
    num_inputs, num_outputs = 10, 3

    key = jax.random.PRNGKey(0)
    kx, kw, kb, kx2 = jax.random.split(key, 4)

    # Deterministic parameter init (mimics PyTorch Linear uniform(-1/sqrt(in), 1/sqrt(in)))
    bound = 1.0 / (num_inputs ** 0.5)
    weight = jax.random.uniform(
        kw, (num_outputs, num_inputs), minval=-bound, maxval=bound, dtype=jnp.float32
    )
    bias = jax.random.uniform(
        kb, (num_outputs,), minval=-bound, maxval=bound, dtype=jnp.float32
    )

    # One-time param prep (transpose only), done at "init", not per forward call.
    w_t, b2d = prepare_params(weight, bias)

    # 1) Tiny batch (primary small-shape check).
    batch = 8
    x = jax.random.normal(kx, (batch, num_inputs), dtype=jnp.float32)
    out = jax.block_until_ready(classification_model(x, w_t, b2d))
    ref = x @ weight.T + bias
    assert out.shape == (batch, num_outputs)
    assert jnp.allclose(out, ref, atol=1e-5, rtol=1e-5)

    # 2) Moderate batch — now stays on the single ungridded pass (no 2-step grid overhead).
    batch_med = 512
    x2 = jax.random.normal(kx2, (batch_med, num_inputs), dtype=jnp.float32)
    out2 = jax.block_until_ready(classification_model(x2, w_t, b2d))
    ref2 = x2 @ weight.T + bias
    assert out2.shape == (batch_med, num_outputs)
    assert jnp.allclose(out2, ref2, atol=1e-5, rtol=1e-5)

    print("KERNEL_OK")
</pallas_src>

<mosaic_0001>
module attributes {stable_mosaic.version = 11 : i64} {
  func.func @linear_kernel(%arg0: memref<8x10xf32, #tpu.memory_space<vmem>>, %arg1: memref<10x3xf32, #tpu.memory_space<vmem>>, %arg2: memref<1x3xf32, #tpu.memory_space<vmem>>, %arg3: memref<8x3xf32, #tpu.memory_space<vmem>>) attributes {dimension_semantics = [], scalar_prefetch = 0 : i64, scratch_operands = 0 : i64, tpu.core_type = #tpu.core_type<tc>} {
    %c0 = arith.constant 0 : index
    %c0_0 = arith.constant 0 : index
    %0 = vector.load %arg0[%c0, %c0_0] : memref<8x10xf32, #tpu.memory_space<vmem>>, vector<8x10xf32>
    %c0_1 = arith.constant 0 : index
    %c0_2 = arith.constant 0 : index
    %1 = vector.load %arg1[%c0_1, %c0_2] : memref<10x3xf32, #tpu.memory_space<vmem>>, vector<10x3xf32>
    %cst = arith.constant dense<0.000000e+00> : vector<8x3xf32>
    %2 = tpu.matmul %0, %1, %cst {dimension_numbers = #tpu.dot_dimension_numbers<[1], [0], [0], [1], [0, 0, 1, 1], [], []>} : vector<8x10xf32>, vector<10x3xf32>, vector<8x3xf32> -> vector<8x3xf32>
    %c0_3 = arith.constant 0 : index
    %c0_4 = arith.constant 0 : index
    %3 = vector.load %arg2[%c0_3, %c0_4] : memref<1x3xf32, #tpu.memory_space<vmem>>, vector<1x3xf32>
    %4 = vector.broadcast %3 : vector<1x3xf32> to vector<8x3xf32>
    %5 = arith.addf %2, %4 : vector<8x3xf32>
    %c0_5 = arith.constant 0 : index
    %c0_6 = arith.constant 0 : index
    %6 = vector.load %arg3[%c0_5, %c0_6] : memref<8x3xf32, #tpu.memory_space<vmem>>, vector<8x3xf32>
    tpu.vector_store %arg3[%c0_5, %c0_6], %5 {strides = array<i32>} : memref<8x3xf32, #tpu.memory_space<vmem>>, vector<8x3xf32>,
    return
  }
}

</mosaic_0001>

<bundles_post_ra>
// kernel: tpu_custom_call.1
= control target key start
LH: loop header
LB: loop body
LE: loop exit
PB: predicated region body
PF: predicated region fallthrough
CT: control target
= control target key end

     0   :  { %vm28_vm0 = vcmask 1041408   ;;  %v123_v0 = vmov 0.0   ;;  %vm124_vm1 = vmmov 0   ;;  %vm24_vm2 = vcmask 80896   ;;  %s160_s1 = inlined_call_operand.vmem [shape: f32[10,3], index: 1, kind: input, shape index: {}]   ;;  %s161_s0 = inlined_call_operand.vmem [shape: f32[8,10], index: 0, kind: input, shape index: {}]   ;;  %s162_s2 = inlined_call_operand.vmem [shape: f32[1,3], index: 2, kind: input, shape index: {}]   ;;  %s163_s3 = inlined_call_operand.vmem [shape: f32[8,3], index: 3, kind: output, shape index: {}]  }
   0x1   :  { %114 = vmatprep.subr.mxu0 %v123_v0  ;;  %v16_v1 = vld [vmem:[%s160_s1 + $0x8] sm:$0x3]  ;;  %v15_v2 = vld [vmem:[%s160_s1] sm:$0xff]  ;;  %118 = vmatprep.mubr.msk.f32.mxu0 %vm124_vm1, %v123_v0  ;;  %vm102_vm3 = vcmask 23552  }
   0x2   :  { %115 = vmatpush3.msk.msra.mxu0 %vm28_vm0, %v16_v1  ;;  %v14_v3 = vld [vmem:[%s161_s0] sm:$0xff] }
   0x3   :  { %116 = vmatprep.subr.mxu0 %v123_v0  ;;  %v108_v4 = vld [vmem:[%s162_s2] ss:$0 sm:$0xff] }
   0x4   :  { %117 = vmatpush3.msra.mxu0 %v15_v2 }
   0x5   :  { %119 = vmatmul.mubr.msk.f32.vlgmr.msra.gmra.mxu0 %vm24_vm2, %v14_v3 }
  0xc5   :  { %v98_v5 = vpop.f32.mrf.mxu0 }
  0xc6   :  { %v99_v6 = vadd.f32 %v108_v4, %v98_v5 }
  0xc7   :  { %v120_v7 = vpop.f32.mrf.mxu0 }
  0xc8   :  { %103 = vst.msk [vmem:[%s163_s3] sm:$0xff] %vm102_vm3, %v99_v6 }

</bundles_post_ra>
